<compile_context>
chip_gen: v7x
topology: tpu7x:2x2x1
jax: 0.10.0
libtpu: 0.0.40
codegen_flags: <defaults>
</compile_context>

<pallas_src>
import functools

import jax
import jax.numpy as jnp
from jax.experimental import pallas as pl
from jax.experimental.pallas import tpu as pltpu

_TILE_N_DEFAULT = 8192                      # max batch rows per grid step
_VMEM_LIMIT_BYTES = 48 * 1024 * 1024        # generous, still < v7x 64 MiB phys
_STREAM_BUDGET_BYTES = 24 * 1024 * 1024     # per-step streamed working set cap
_SLOPE = 0.01                               # F.leaky_relu default slope


def _leaky_relu(x):
    # Exactly equivalent to where(x > 0, x, 0.01 * x) for slope in (0, 1);
    # 2 VPU ops (mul + max) instead of 3 (cmp + mul + select).
    return jnp.maximum(x, _SLOPE * x)


def _round_up(x, m):
    return ((x + m - 1) // m) * m


def _cdiv(a, b):
    return -(-a // b)


def _choose_tiling(n, tile_n, bytes_per_row):
    """Balanced 128-aligned lane tiles; >= 2 grid steps when possible (v7x TCs)."""
    n128 = _round_up(n, 128)
    m = n128 // 128
    # Cap the tile so the streamed per-step working set stays within budget
    # (matters most on v7x: 64 MiB VMEM but 3.2 TB/s HBM).
    cap_tiles = max(_STREAM_BUDGET_BYTES // max(bytes_per_row, 1) // 128, 1)
    max_tile = max(min(tile_n // 128, cap_tiles), 1) * 128
    num_tiles = _cdiv(n128, max_tile)
    if m >= 2:
        num_tiles = max(num_tiles, 2)       # feed both TensorCores on v7x
    num_tiles = min(num_tiles, m)
    lane_tile = _round_up(_cdiv(n128, num_tiles), 128)
    return num_tiles, lane_tile


# ---------------------------------------------------------------------------
# Kernels
# ---------------------------------------------------------------------------

def _mlp_rowmajor_kernel(x_ref, w1t_ref, b1_ref, w2t_ref, b2_ref, w3t_ref,
                         b3_ref, o_ref):
    """Row-major path (large O): batch on sublanes, output features on lanes.

    x: (TILE, b)   w*t: (in, out)   b*: (1, out)   o: (TILE, O) lane-dense.
    """
    w1t = w1t_ref[...]
    h = jnp.dot(x_ref[...], w1t, preferred_element_type=jnp.float32)
    h = _leaky_relu(h + b1_ref[...])
    w2t = w2t_ref[...]
    h = jnp.dot(h.astype(w2t.dtype), w2t, preferred_element_type=jnp.float32)
    h = _leaky_relu(h + b2_ref[...])
    w3t = w3t_ref[...]
    y = jnp.dot(h.astype(w3t.dtype), w3t, preferred_element_type=jnp.float32)
    o_ref[...] = (y + b3_ref[...]).astype(o_ref.dtype)


def _mlp_featmajor_kernel(xt_ref, w1_ref, b1_ref, w2_ref, b2_ref, w3_ref,
                          b3_ref, o_ref):
    """Feature-major path (tiny O): batch on the 128-lane axis everywhere.

    x^T: (b, TILE)   w*: (out, in)   b*: (out, 1)   o: (O, TILE).
    """
    h = jnp.dot(w1_ref[...], xt_ref[...], preferred_element_type=jnp.float32)
    h = _leaky_relu(h + b1_ref[...])
    w2 = w2_ref[...]
    h = jnp.dot(w2, h.astype(w2.dtype), preferred_element_type=jnp.float32)
    h = _leaky_relu(h + b2_ref[...])
    w3 = w3_ref[...]
    y = jnp.dot(w3, h.astype(w3.dtype), preferred_element_type=jnp.float32)
    o_ref[...] = (y + b3_ref[...]).astype(o_ref.dtype)


# ---------------------------------------------------------------------------
# Wrapper
# ---------------------------------------------------------------------------

@functools.partial(jax.jit,
                   static_argnames=("b", "input_size", "tile_n", "use_bf16"))
def decoder_net_simple_forward(x, params, *, b, input_size,
                               tile_n=_TILE_N_DEFAULT, use_bf16=False):
    """Pallas implementation of decoderNetSimple.forward (spectral_norm=False).

    x: any shape whose total size is a multiple of `b` (torch's view(-1, 1, b)).
    params: PyTorch-layout weights/biases:
        w1 (H, b), w2 (H, H), w3 (O, H)  with H = 16*alpha, O = input_size;
        b1 (H,), b2 (H,), b3 (O,).
    Returns f32 (N, 1, input_size), or (N, 1, 20, 20) when input_size == 400.
    """
    n = x.size // b
    hidden = params["w1"].shape[0]
    out = input_size
    cdt = jnp.bfloat16 if use_bf16 else jnp.float32
    ix = jnp.dtype(cdt).itemsize
    row_major = out >= 128        # lane-dense output without any transposes

    # Per-row VMEM estimate (accounts for lane padding of narrow minor dims).
    if row_major:
        lanes = lambda d: _round_up(d, 128)
        bytes_per_row = (2 * ix * lanes(b) + 2 * 4 * lanes(hidden)
                         + 2 * 4 * lanes(out))
    else:
        bytes_per_row = 2 * ix * b + 3 * 4 * hidden + 2 * 4 * max(out, 8)

    num_tiles, lane_tile = _choose_tiling(n, tile_n, bytes_per_row)
    n_pad = num_tiles * lane_tile
    grid = (num_tiles,)
    const = lambda i: (0, 0)

    w1 = params["w1"].astype(cdt)
    w2 = params["w2"].astype(cdt)
    w3 = params["w3"].astype(cdt)
    b1 = params["b1"].astype(jnp.float32)
    b2 = params["b2"].astype(jnp.float32)
    b3 = params["b3"].astype(jnp.float32)

    flops = 2 * n_pad * (b * hidden + hidden * hidden + hidden * out)
    weight_bytes = (ix * (b * hidden + hidden * hidden + hidden * out)
                    + 4 * (2 * hidden + out))
    cost = pl.CostEstimate(flops=flops, transcendentals=0,
                           bytes_accessed=n_pad * (b * ix + out * 4)
                           + weight_bytes)
    cparams = pltpu.CompilerParams(
        dimension_semantics=("parallel",),      # N-tiles are independent
        vmem_limit_bytes=_VMEM_LIMIT_BYTES,
    )

    x2d = x.reshape(n, b).astype(cdt)

    if row_major:
        # --- large O (e.g. input_size=400): zero wrapper transposes ---------
        if n_pad != n:
            x2d = jnp.pad(x2d, ((0, n_pad - n), (0, 0)))
        # Weight/bias specs are constant-index and stay VMEM-resident; the
        # redundant second buffer is negligible (~56 KiB) so no Buffered(1).
        y_pad = pl.pallas_call(
            _mlp_rowmajor_kernel,
            out_shape=jax.ShapeDtypeStruct((n_pad, out), jnp.float32),
            grid_spec=pltpu.PrefetchScalarGridSpec(
                num_scalar_prefetch=0,
                grid=grid,
                in_specs=[
                    pl.BlockSpec((lane_tile, b), lambda i: (i, 0)),   # x stream
                    pl.BlockSpec((b, hidden), const),                 # w1^T
                    pl.BlockSpec((1, hidden), const),                 # b1
                    pl.BlockSpec((hidden, hidden), const),            # w2^T
                    pl.BlockSpec((1, hidden), const),                 # b2
                    pl.BlockSpec((hidden, out), const),               # w3^T
                    pl.BlockSpec((1, out), const),                    # b3
                ],
                out_specs=pl.BlockSpec((lane_tile, out), lambda i: (i, 0)),
            ),
            compiler_params=cparams,
            cost_estimate=cost,
        )(x2d, w1.T, b1.reshape(1, hidden), w2.T, b2.reshape(1, hidden),
          w3.T, b3.reshape(1, out))
        y = y_pad if n_pad == n else y_pad[:n]
    else:
        # --- tiny O (e.g. input_size=2): feature-major, lane-dense compute ---
        # Wrapper transpose/pad touch only (N, b) and (O, N) arrays, both tiny
        # for this compute-bound config.
        xt = x2d.T
        if n_pad != n:
            xt = jnp.pad(xt, ((0, 0), (0, n_pad - n)))
        yT_pad = pl.pallas_call(
            _mlp_featmajor_kernel,
            out_shape=jax.ShapeDtypeStruct((out, n_pad), jnp.float32),
            grid_spec=pltpu.PrefetchScalarGridSpec(
                num_scalar_prefetch=0,
                grid=grid,
                in_specs=[
                    pl.BlockSpec((b, lane_tile), lambda i: (0, i)),   # x^T stream
                    pl.BlockSpec((hidden, b), const),                 # w1
                    pl.BlockSpec((hidden, 1), const),                 # b1
                    pl.BlockSpec((hidden, hidden), const),            # w2
                    pl.BlockSpec((hidden, 1), const),                 # b2
                    pl.BlockSpec((out, hidden), const),               # w3
                    pl.BlockSpec((out, 1), const),                    # b3
                ],
                out_specs=pl.BlockSpec((out, lane_tile), lambda i: (0, i)),
            ),
            compiler_params=cparams,
            cost_estimate=cost,
        )(xt, w1, b1.reshape(hidden, 1), w2, b2.reshape(hidden, 1),
          w3, b3.reshape(out, 1))
        y = (yT_pad.T if n_pad == n else yT_pad[:, :n].T)   # (N, O), O tiny

    if input_size == 400:
        return y.reshape(n, 1, 20, 20)
    return y.reshape(n, 1, input_size)


# ---------------------------------------------------------------------------
# Parameters (xavier_normal_ weights, zero biases, as in init_weights) + ref
# ---------------------------------------------------------------------------

def init_params(key, *, b, alpha, input_size):
    hidden = 16 * alpha

    def xavier_normal(key, fan_out, fan_in):
        std = (2.0 / (fan_in + fan_out)) ** 0.5
        return std * jax.random.normal(key, (fan_out, fan_in), dtype=jnp.float32)

    k1, k2, k3 = jax.random.split(key, 3)
    return {
        "w1": xavier_normal(k1, hidden, b),
        "b1": jnp.zeros((hidden,), jnp.float32),
        "w2": xavier_normal(k2, hidden, hidden),
        "b2": jnp.zeros((hidden,), jnp.float32),
        "w3": xavier_normal(k3, input_size, hidden),
        "b3": jnp.zeros((input_size,), jnp.float32),
    }


def _reference_forward(x, params, *, b, input_size):
    """Pure-JAX reference mirroring the PyTorch forward."""
    n = x.size // b
    h = x.reshape(n, b).astype(jnp.float32)
    h = jnp.where(h @ params["w1"].T + params["b1"] > 0,
                  h @ params["w1"].T + params["b1"],
                  _SLOPE * (h @ params["w1"].T + params["b1"]))
    h2 = h @ params["w2"].T + params["b2"]
    h2 = jnp.where(h2 > 0, h2, _SLOPE * h2)
    y = h2 @ params["w3"].T + params["b3"]
    if input_size == 400:
        return y.reshape(n, 1, 20, 20)
    return y.reshape(n, 1, input_size)


if __name__ == "__main__":
    key = jax.random.PRNGKey(0)
    k1, k2, k3, k4 = jax.random.split(key, 4)

    # Config 1: module defaults (alpha=2 -> hidden=32, b=8, input_size=2).
    # batch=300 is not 128-aligned -> exercises balanced tiles + tail padding,
    # grid=(2,) and the feature-major tiny-O path.
    alpha, b, input_size = 2, 8, 2
    batch = 300
    params = init_params(k1, b=b, alpha=alpha, input_size=input_size)
    x = jax.random.normal(k2, (batch, 1, b), dtype=jnp.float32)
    y = jax.block_until_ready(
        decoder_net_simple_forward(x, params, b=b, input_size=input_size))
    y_ref = _reference_forward(x, params, b=b, input_size=input_size)
    assert y.shape == (batch, 1, input_size), y.shape
    assert jnp.allclose(y, y_ref, atol=1e-5, rtol=1e-5), "config1 mismatch"

    # Config 2: input_size=400 (20x20 head) -> row-major lane-dense path;
    # batch=256 matches the tiling exactly -> zero wrapper pad/slice/transpose.
    alpha2, b2_, input_size2 = 2, 8, 400
    batch2 = 256
    params2 = init_params(k3, b=b2_, alpha=alpha2, input_size=input_size2)
    x2 = jax.random.normal(k4, (batch2, 1, b2_), dtype=jnp.float32)
    y2 = jax.block_until_ready(
        decoder_net_simple_forward(x2, params2, b=b2_, input_size=input_size2))
    y2_ref = _reference_forward(x2, params2, b=b2_, input_size=input_size2)
    assert y2.shape == (batch2, 1, 20, 20), y2.shape
    assert jnp.allclose(y2, y2_ref, atol=1e-5, rtol=1e-5), "config2 mismatch"

    # Config 2 with the bf16 streaming option (f32 accumulation, f32 output).
    y2_bf16 = jax.block_until_ready(
        decoder_net_simple_forward(x2, params2, b=b2_, input_size=input_size2,
                                   use_bf16=True))
    assert jnp.allclose(y2_bf16, y2_ref, atol=5e-2, rtol=5e-2), "bf16 mismatch"

    print("KERNEL_OK")
</pallas_src>

<mosaic_0001>
module attributes {stable_mosaic.version = 11 : i64} {
  func.func @_mlp_featmajor_kernel(%arg0: i32, %arg1: memref<8x256xf32, #tpu.memory_space<vmem>>, %arg2: memref<32x8xf32, #tpu.memory_space<vmem>>, %arg3: memref<32x1xf32, #tpu.memory_space<vmem>>, %arg4: memref<32x32xf32, #tpu.memory_space<vmem>>, %arg5: memref<32x1xf32, #tpu.memory_space<vmem>>, %arg6: memref<2x32xf32, #tpu.memory_space<vmem>>, %arg7: memref<2x1xf32, #tpu.memory_space<vmem>>, %arg8: memref<2x256xf32, #tpu.memory_space<vmem>>) attributes {dimension_semantics = [#tpu.dimension_semantics<parallel>], iteration_bounds = array<i64: 2>, scalar_prefetch = 0 : i64, scratch_operands = 0 : i64, tpu.core_type = #tpu.core_type<tc>, window_params = [{transform_indices = @transform_0, window_bounds = array<i64: 8, 256>}, {pipeline_mode = #tpu.pipeline_mode<synchronous>, transform_indices = @transform_1, window_bounds = array<i64: 32, 8>}, {pipeline_mode = #tpu.pipeline_mode<synchronous>, transform_indices = @transform_2, window_bounds = array<i64: 32, 1>}, {pipeline_mode = #tpu.pipeline_mode<synchronous>, transform_indices = @transform_3, window_bounds = array<i64: 32, 32>}, {pipeline_mode = #tpu.pipeline_mode<synchronous>, transform_indices = @transform_4, window_bounds = array<i64: 32, 1>}, {pipeline_mode = #tpu.pipeline_mode<synchronous>, transform_indices = @transform_5, window_bounds = array<i64: 2, 32>}, {pipeline_mode = #tpu.pipeline_mode<synchronous>, transform_indices = @transform_6, window_bounds = array<i64: 2, 1>}, {transform_indices = @transform_7, window_bounds = array<i64: 2, 256>}]} {
    %c0 = arith.constant 0 : index
    %c0_0 = arith.constant 0 : index
    %0 = vector.load %arg2[%c0, %c0_0] : memref<32x8xf32, #tpu.memory_space<vmem>>, vector<32x8xf32>
    %c0_1 = arith.constant 0 : index
    %c0_2 = arith.constant 0 : index
    %1 = vector.load %arg1[%c0_1, %c0_2] : memref<8x256xf32, #tpu.memory_space<vmem>>, vector<8x256xf32>
    %cst = arith.constant dense<0.000000e+00> : vector<32x256xf32>
    %2 = tpu.matmul %0, %1, %cst {dimension_numbers = #tpu.dot_dimension_numbers<[1], [0], [0], [1], [0, 0, 1, 1], [], []>} : vector<32x8xf32>, vector<8x256xf32>, vector<32x256xf32> -> vector<32x256xf32>
    %c0_3 = arith.constant 0 : index
    %c0_4 = arith.constant 0 : index
    %3 = vector.load %arg3[%c0_3, %c0_4] : memref<32x1xf32, #tpu.memory_space<vmem>>, vector<32x1xf32>
    %4 = vector.broadcast %3 : vector<32x1xf32> to vector<32x256xf32>
    %5 = arith.addf %2, %4 : vector<32x256xf32>
    %cst_5 = arith.constant 0.00999999977 : f32
    %6 = vector.broadcast %cst_5 : f32 to vector<32x256xf32>
    %7 = arith.mulf %6, %5 : vector<32x256xf32>
    %8 = arith.maximumf %5, %7 : vector<32x256xf32>
    %c0_6 = arith.constant 0 : index
    %c0_7 = arith.constant 0 : index
    %9 = vector.load %arg4[%c0_6, %c0_7] : memref<32x32xf32, #tpu.memory_space<vmem>>, vector<32x32xf32>
    %cst_8 = arith.constant dense<0.000000e+00> : vector<32x256xf32>
    %10 = tpu.matmul %9, %8, %cst_8 {dimension_numbers = #tpu.dot_dimension_numbers<[1], [0], [0], [1], [0, 0, 1, 1], [], []>} : vector<32x32xf32>, vector<32x256xf32>, vector<32x256xf32> -> vector<32x256xf32>
    %c0_9 = arith.constant 0 : index
    %c0_10 = arith.constant 0 : index
    %11 = vector.load %arg5[%c0_9, %c0_10] : memref<32x1xf32, #tpu.memory_space<vmem>>, vector<32x1xf32>
    %12 = vector.broadcast %11 : vector<32x1xf32> to vector<32x256xf32>
    %13 = arith.addf %10, %12 : vector<32x256xf32>
    %cst_11 = arith.constant 0.00999999977 : f32
    %14 = vector.broadcast %cst_11 : f32 to vector<32x256xf32>
    %15 = arith.mulf %14, %13 : vector<32x256xf32>
    %16 = arith.maximumf %13, %15 : vector<32x256xf32>
    %c0_12 = arith.constant 0 : index
    %c0_13 = arith.constant 0 : index
    %17 = vector.load %arg6[%c0_12, %c0_13] : memref<2x32xf32, #tpu.memory_space<vmem>>, vector<2x32xf32>
    %cst_14 = arith.constant dense<0.000000e+00> : vector<2x256xf32>
    %18 = tpu.matmul %17, %16, %cst_14 {dimension_numbers = #tpu.dot_dimension_numbers<[1], [0], [0], [1], [0, 0, 1, 1], [], []>} : vector<2x32xf32>, vector<32x256xf32>, vector<2x256xf32> -> vector<2x256xf32>
    %c0_15 = arith.constant 0 : index
    %c0_16 = arith.constant 0 : index
    %19 = vector.load %arg7[%c0_15, %c0_16] : memref<2x1xf32, #tpu.memory_space<vmem>>, vector<2x1xf32>
    %20 = vector.broadcast %19 : vector<2x1xf32> to vector<2x256xf32>
    %21 = arith.addf %18, %20 : vector<2x256xf32>
    %c0_17 = arith.constant 0 : index
    %c0_18 = arith.constant 0 : index
    %22 = vector.load %arg8[%c0_17, %c0_18] : memref<2x256xf32, #tpu.memory_space<vmem>>, vector<2x256xf32>
    tpu.vector_store %arg8[%c0_17, %c0_18], %21 {strides = array<i32>} : memref<2x256xf32, #tpu.memory_space<vmem>>, vector<2x256xf32>,
    return
  }
  func.func @transform_0(%arg0: i32) -> (i32, i32) {
    %c0_i32 = arith.constant 0 : i32
    %c0_i32_0 = arith.constant 0 : i32
    return %c0_i32, %arg0 : i32, i32
  }
  func.func @transform_1(%arg0: i32) -> (i32, i32) {
    %c0_i32 = arith.constant 0 : i32
    %c0_i32_0 = arith.constant 0 : i32
    %c0_i32_1 = arith.constant 0 : i32
    return %c0_i32, %c0_i32_0 : i32, i32
  }
  func.func @transform_2(%arg0: i32) -> (i32, i32) {
    %c0_i32 = arith.constant 0 : i32
    %c0_i32_0 = arith.constant 0 : i32
    %c0_i32_1 = arith.constant 0 : i32
    return %c0_i32, %c0_i32_0 : i32, i32
  }
  func.func @transform_3(%arg0: i32) -> (i32, i32) {
    %c0_i32 = arith.constant 0 : i32
    %c0_i32_0 = arith.constant 0 : i32
    %c0_i32_1 = arith.constant 0 : i32
    return %c0_i32, %c0_i32_0 : i32, i32
  }
  func.func @transform_4(%arg0: i32) -> (i32, i32) {
    %c0_i32 = arith.constant 0 : i32
    %c0_i32_0 = arith.constant 0 : i32
    %c0_i32_1 = arith.constant 0 : i32
    return %c0_i32, %c0_i32_0 : i32, i32
  }
  func.func @transform_5(%arg0: i32) -> (i32, i32) {
    %c0_i32 = arith.constant 0 : i32
    %c0_i32_0 = arith.constant 0 : i32
    %c0_i32_1 = arith.constant 0 : i32
    return %c0_i32, %c0_i32_0 : i32, i32
  }
  func.func @transform_6(%arg0: i32) -> (i32, i32) {
    %c0_i32 = arith.constant 0 : i32
    %c0_i32_0 = arith.constant 0 : i32
    %c0_i32_1 = arith.constant 0 : i32
    return %c0_i32, %c0_i32_0 : i32, i32
  }
  func.func @transform_7(%arg0: i32) -> (i32, i32) {
    %c0_i32 = arith.constant 0 : i32
    %c0_i32_0 = arith.constant 0 : i32
    return %c0_i32, %arg0 : i32, i32
  }
}

</mosaic_0001>

<bundles_post_ra>
// kernel: decoder_net_simple_forward.1
= control target key start
LH: loop header
LB: loop body
LE: loop exit
PB: predicated region body
PF: predicated region fallthrough
CT: control target
= control target key end

     0   :  { %s824_s24 = smov 0   ;;  %s917_s0 = inlined_call_operand.vmem [shape: f32[8,512], index: 0, kind: input, shape index: {}]   ;;  %s918_s1 = inlined_call_operand.vmem [shape: f32[32,8], index: 1, kind: input, shape index: {}]   ;;  %s919_s2 = inlined_call_operand.vmem [shape: f32[32,1], index: 2, kind: input, shape index: {}]   ;;  %s920_s3 = inlined_call_operand.vmem [shape: f32[32,32], index: 3, kind: input, shape index: {}]   ;;  %s921_s4 = inlined_call_operand.vmem [shape: f32[32,1], index: 4, kind: input, shape index: {}]   ;;  %s922_s5 = inlined_call_operand.vmem [shape: f32[2,32], index: 5, kind: input, shape index: {}]   ;;  %s923_s6 = inlined_call_operand.vmem [shape: f32[2,1], index: 6, kind: input, shape index: {}]   ;;  %s924_s7 = inlined_call_operand.vmem [shape: f32[2,512], index: 7, kind: output, shape index: {}]  }
   0x1 LB: > { %s725_s25 = sadd.s32 4294967295, %s780_s24   ;;  %p729_p0 = scmp.ge.s32.totalorder %s780_s24, 1  ;;  %s780_s24 = sphi %s824_s24, %s17_s24  }
   0x2   : > { %p238_p1 = scmp.lt.s32.totalorder %s780_s24, 3 }
   0x4   : > { %p239_p2 = pnand %p729_p0, %p238_p1 }
   0x5   : > { %s730_s26 = sshll.u32 (!%p239_p2), %s725_s25, 1  ;;  %v782_v0 = vmov (!%p239_p2), 0.0   ;;  %v288_v1 = vld [vmem:[%s919_s2] sm:$0xff] (!%p239_p2)  ;;  %v783_v2 = vmov (!%p239_p2), 0   ;;  %v290_v3 = vld [vmem:[%s919_s2 + $0x10] sm:$0xff] (!%p239_p2)  ;;  %v289_v4 = vld [vmem:[%s919_s2 + $0x8] sm:$0xff] (!%p239_p2) }
   0x6   : > { %242 = sbr.rel (%p239_p2) target bundleno = 711 (0x2c7), region = 48  ;;  %p271_p3 = scmp.lt.s32.totalorder (!%p239_p2), %s730_s26, 3  ;;  %389 = vmatprep.mubr.f32.mxu0 (!%p239_p2), %v782_v0  ;;  %535 = vmatprep.mubr.f32.mxu1 (!%p239_p2), %v782_v0  ;;  %v291_v5 = vld [vmem:[%s919_s2 + $0x18] sm:$0xff] (!%p239_p2)  ;;  %v282_v8 = vld [vmem:[%s918_s1] sm:$0xff] (!%p239_p2)  ;;  %vm312_vm0 = vcmask (!%p239_p2), 64512   ;;  %v435_v10 = vld [vmem:[%s921_s4 + $0x8] sm:$0xff] (!%p239_p2) }
   0x7   : > { %772 = vset.pattern.permute.xlu0 (!%p239_p2), %v783_v2  ;;  %773 = vset.pattern.permute.xlu1 (!%p239_p2), %v783_v2  ;;  %v434_v9 = vld [vmem:[%s921_s4] sm:$0xff] (!%p239_p2)  ;;  %v283_v11 = vld [vmem:[%s918_s1 + $0x8] sm:$0xff] (!%p239_p2)  ;;  %v436_v12 = vld [vmem:[%s921_s4 + $0x10] sm:$0xff] (!%p239_p2)  ;;  %vm458_vm1 = vcmask (!%p239_p2), 261120  }
   0x8   : > { %294 = vperm.xlu0 (!%p239_p2), %772, %v288_v1   ;;  %304 = vperm.xlu1 (!%p239_p2), %773, %v290_v3   ;;  %v437_v13 = vld [vmem:[%s921_s4 + $0x18] sm:$0xff] (!%p239_p2)  ;;  %v284_v14 = vld [vmem:[%s918_s1 + $0x10] sm:$0xff] (!%p239_p2)  ;;  %v577_v15 = vld [vmem:[%s923_s6] sm:$0x3] (!%p239_p2) }
   0x9   : > { %v285_v16 = vld [vmem:[%s918_s1 + $0x18] sm:$0xff] (!%p239_p2)  ;;  %v430_v57 = vld [vmem:[%s920_s3] sm:$0xff] (!%p239_p2)  ;;  %v431_v58 = vld [vmem:[%s920_s3 + $0x8] sm:$0xff] (!%p239_p2) }
   0xa   : > { %v432_v59 = vld [vmem:[%s920_s3 + $0x10] sm:$0xff] (!%p239_p2)  ;;  %v433_v60 = vld [vmem:[%s920_s3 + $0x18] sm:$0xff] (!%p239_p2) }
   0xc   : > { %299 = vperm.xlu0 (!%p239_p2), %772, %v289_v4   ;;  %309 = vperm.xlu1 (!%p239_p2), %773, %v291_v5  }
   0xd   : > { %s926_s26 = smov (!%p271_p3, %s730_s26), 3 }
   0xe   : > { %s731_s12 = sshll.u32 %s926_s26, 3  ;;  %s733_s23 = sshll.u32 %s926_s26, 1 }
   0xf   : > { %s274_s15 = scalar_lea.vmem %s917_s0, %s731_s12  ;;  %s280_s28 = scalar_lea.vmem %s924_s7, %s733_s23 }
  0x10   : > { %v287_v6 = vld [vmem:[%s274_s15 + $0x8] sm:$0xff]  ;;  %v286_v7 = vld [vmem:[%s274_s15] sm:$0xff]  ;;  %440 = vperm.xlu0 %772, %v434_v9   ;;  %445 = vperm.xlu1 %773, %v435_v10  }
  0x11   : > { %325 = vmatprep.subr.mxu0 %v287_v6 }
  0x12   : > { %326 = vmatpush1.msra.mxu0 %v286_v7 }
  0x13   : > { %734 = vmatmul.mubr.msk.f32.vlgmr.msra.gmra.mrb[0].mxu0 %vm312_vm0, %v282_v8 }
  0x14   : > { %395 = vmatprep.mubr.f32.mxu0 %v782_v0  ;;  %450 = vperm.xlu0 %772, %v436_v12  }
  0x15   : > { %455 = vperm.xlu1 %773, %v437_v13  }
  0x17   : > { %735 = vmatmul.mubr.msk.f32.gmra.mrb[2].mxu0 %vm312_vm0, %v283_v11 }
  0x18   : > { %401 = vmatprep.mubr.f32.mxu0 %v782_v0  ;;  %580 = vperm.xlu0 %772, %v577_v15  }
  0x1b   : > { %736 = vmatmul.mubr.msk.f32.gmra.mrb[4].mxu0 %vm312_vm0, %v284_v14 }
  0x1c   : > { %407 = vmatprep.mubr.f32.mxu0 %v782_v0 }
  0x1f   : > { %737 = vmatmul.mubr.msk.f32.gmra.mrb[6].mxu0 %vm312_vm0, %v285_v16 }
  0x20   : > { %650 = vmatprep.mubr.f32.mxu0 %v782_v0 }
  0x87   : > { %v295_v17 = vpop.permute.xlu0 %294  ;;  %v305_v27 = vpop.permute.xlu1 %304 }
  0x8b   : > { %v300_v22 = vpop.permute.xlu0 %299  ;;  %v310_v41 = vpop.permute.xlu1 %309 }
  0x8f   : > { %v441_v61 = vpop.permute.xlu0 %440  ;;  %v446_v3 = vpop.permute.xlu1 %445 }
  0xe6   : > { %v391_v18 = vpop.f32.mrb[0].mxu0 }
  0xe7   : > { %v392_v19 = vadd.f32 %v391_v18, %v295_v17  ;;  %v393_v20 = vpop.f32.mrb[1].mxu0 }
  0xe8   : > { %v394_v21 = vadd.f32 %v393_v20, %v295_v17 }
  0xe9   : > { %v414_v24 = vmul.f32 0.01, %v392_v19 }
  0xea   : > { %v397_v23 = vpop.f32.mrb[2].mxu0  ;;  %v415_v28 = vmul.f32 0.01, %v394_v21 }
  0xeb   : > { %v398_v25 = vadd.f32 %v397_v23, %v300_v22  ;;  %v399_v26 = vpop.f32.mrb[3].mxu0  ;;  %v422_v33 = vmax.f32 %v392_v19, %v414_v24 }
  0xec   : > { %v400_v29 = vadd.f32 %v399_v26, %v300_v22  ;;  %v423_v38 = vmax.f32 %v394_v21, %v415_v28  ;;  %v456_v21 = vpop.permute.xlu1 %455 }
  0xed   : > { %v416_v30 = vmul.f32 0.01, %v398_v25 }
  0xee   : > { %v417_v31 = vmul.f32 0.01, %v400_v29  ;;  %v403_v32 = vpop.f32.mrb[4].mxu0 }
  0xef   : > { %v424_v34 = vmax.f32 %v398_v25, %v416_v30  ;;  %v404_v35 = vadd.f32 %v403_v32, %v305_v27  ;;  %v405_v36 = vpop.f32.mrb[5].mxu0 }
  0xf0   : > { %v406_v37 = vadd.f32 %v405_v36, %v305_v27  ;;  %v425_v39 = vmax.f32 %v400_v29, %v417_v31 }
  0xf1   : > { %v748_v40 = vpack.c.bf16 %v424_v34, %v422_v33  ;;  %v418_v44 = vmul.f32 0.01, %v404_v35 }
  0xf2   : > { %v409_v42 = vpop.f32.mrb[6].mxu0  ;;  %v746_v43 = vpack.c.bf16 %v425_v39, %v423_v38  ;;  %v419_v47 = vmul.f32 0.01, %v406_v37 }
  0xf3   : > { %v410_v45 = vadd.f32 %v409_v42, %v310_v41  ;;  %v411_v46 = vpop.f32.mrb[7].mxu0  ;;  %v426_v51 = vmax.f32 %v404_v35, %v418_v44 }
  0xf4   : > { %v412_v48 = vadd.f32 %v411_v46, %v310_v41  ;;  %747 = vmatprep.subr.bf16.mxu1 %v746_v43  ;;  %v427_v53 = vmax.f32 %v406_v37, %v419_v47  ;;  %v576_v37 = vld [vmem:[%s922_s5] sm:$0x3] }
  0xf5   : > { %v420_v49 = vmul.f32 0.01, %v410_v45  ;;  %749 = vmatpush1.bf16.msra.mxu1 %v748_v40 }
  0xf6   : > { %v421_v50 = vmul.f32 0.01, %v412_v48 }
  0xf7   : > { %v428_v52 = vmax.f32 %v410_v45, %v420_v49 }
  0xf8   : > { %v429_v54 = vmax.f32 %v412_v48, %v421_v50 }
  0xf9   : > { %v752_v55 = vpack.c.bf16 %v428_v52, %v426_v51 }
  0xfa   : > { %v750_v56 = vpack.c.bf16 %v429_v54, %v427_v53 }
  0xfc   : > { %751 = vmatprep.subr.bf16.mxu1 %v750_v56 }
  0xfd   : > { %753 = vmatpush1.bf16.msra.mxu1 %v752_v55 }
 0x100   : > { %738 = vmatmul.mubr.msk.f32.vlgmr.msra.gmra.mrb[0].mxu1 %vm458_vm1, %v430_v57 }
 0x101   : > { %541 = vmatprep.mubr.f32.mxu1 %v782_v0 }
 0x104   : > { %739 = vmatmul.mubr.msk.f32.gmra.mrb[2].mxu1 %vm458_vm1, %v431_v58 }
 0x105   : > { %547 = vmatprep.mubr.f32.mxu1 %v782_v0 }
 0x108   : > { %740 = vmatmul.mubr.msk.f32.gmra.mrb[4].mxu1 %vm458_vm1, %v432_v59 }
 0x109   : > { %553 = vmatprep.mubr.f32.mxu1 %v782_v0  ;;  %v451_v0 = vpop.permute.xlu0 %450 }
 0x10c   : > { %741 = vmatmul.mubr.msk.f32.gmra.mrb[6].mxu1 %vm458_vm1, %v433_v60 }
 0x10d   : > { %v581_v38 = vpop.permute.xlu0 %580 }
 0x1d3   : > { %v537_v62 = vpop.f32.mrb[0].mxu1 }
 0x1d4   : > { %v538_v63 = vadd.f32 %v537_v62, %v441_v61  ;;  %v539_v1 = vpop.f32.mrb[1].mxu1 }
 0x1d5   : > { %v540_v2 = vadd.f32 %v539_v1, %v441_v61 }
 0x1d6   : > { %v560_v5 = vmul.f32 0.01, %v538_v63 }
 0x1d7   : > { %v543_v4 = vpop.f32.mrb[2].mxu1  ;;  %v561_v8 = vmul.f32 0.01, %v540_v2 }
 0x1d8   : > { %v544_v6 = vadd.f32 %v543_v4, %v446_v3  ;;  %v545_v7 = vpop.f32.mrb[3].mxu1  ;;  %v568_v13 = vmax.f32 %v538_v63, %v560_v5 }
 0x1d9   : > { %v546_v9 = vadd.f32 %v545_v7, %v446_v3  ;;  %v569_v17 = vmax.f32 %v540_v2, %v561_v8 }
 0x1da   : > { %v562_v10 = vmul.f32 0.01, %v544_v6 }
 0x1db   : > { %v563_v11 = vmul.f32 0.01, %v546_v9  ;;  %v549_v12 = vpop.f32.mrb[4].mxu1 }
 0x1dc   : > { %v570_v14 = vmax.f32 %v544_v6, %v562_v10  ;;  %v550_v15 = vadd.f32 %v549_v12, %v451_v0  ;;  %v551_v16 = vpop.f32.mrb[5].mxu1 }
 0x1dd   : > { %v571_v18 = vmax.f32 %v546_v9, %v563_v11  ;;  %v552_v19 = vadd.f32 %v551_v16, %v451_v0 }
 0x1de   : > { %v756_v20 = vpack.c.bf16 %v570_v14, %v568_v13  ;;  %v564_v24 = vmul.f32 0.01, %v550_v15 }
 0x1df   : > { %v555_v22 = vpop.f32.mrb[6].mxu1  ;;  %v754_v23 = vpack.c.bf16 %v571_v18, %v569_v17  ;;  %v565_v27 = vmul.f32 0.01, %v552_v19 }
 0x1e0   : > { %v556_v25 = vadd.f32 %v555_v22, %v456_v21  ;;  %v557_v26 = vpop.f32.mrb[7].mxu1  ;;  %v572_v31 = vmax.f32 %v550_v15, %v564_v24 }
 0x1e1   : > { %v558_v28 = vadd.f32 %v557_v26, %v456_v21  ;;  %755 = vmatprep.subr.bf16.mxu0 %v754_v23  ;;  %v573_v33 = vmax.f32 %v552_v19, %v565_v27 }
 0x1e2   : > { %v566_v29 = vmul.f32 0.01, %v556_v25  ;;  %757 = vmatpush1.bf16.msra.mxu0 %v756_v20 }
 0x1e3   : > { %v567_v30 = vmul.f32 0.01, %v558_v28 }
 0x1e4   : > { %v574_v32 = vmax.f32 %v556_v25, %v566_v29 }
 0x1e5   : > { %v575_v34 = vmax.f32 %v558_v28, %v567_v30 }
 0x1e6   : > { %v760_v35 = vpack.c.bf16 %v574_v32, %v572_v31 }
 0x1e7   : > { %v758_v36 = vpack.c.bf16 %v575_v34, %v573_v33 }
 0x1e9   : > { %759 = vmatprep.subr.bf16.mxu0 %v758_v36 }
 0x1ea   : > { %761 = vmatpush1.bf16.msra.mxu0 %v760_v35 }
 0x1ed   : > { %742 = vmatmul.mubr.msk.f32.vlgmr.msra.gmra.mrb[8].mxu0 %vm458_vm1, %v576_v37 }
 0x2c0   : > { %v652_v39 = vpop.f32.mrb[8].mxu0 }
 0x2c1   : > { %v653_v40 = vadd.f32 %v652_v39, %v581_v38  ;;  %v654_v41 = vpop.f32.mrb[9].mxu0 }
 0x2c2   : > { %v655_v42 = vadd.f32 %v654_v41, %v581_v38 }
 0x2c4   : > { %v659_v43 = vcombine.low %v653_v40, %v655_v42 }
 0x2c6   : > { %743 = vst.sshfl [vmem:[%s280_s28] sm:$0x33 pattern:$0x76325410] %v659_v43 }
 0x2c7 PF: > { %s17_s24 = sadd.s32 1, %s780_s24  }
 0x2c8   : > { %p14_p4 = scmp.ge.s32.totalorder %s17_s24, 4  }
 0x2ca   :  { %16 = sbr.rel (!%p14_p4) target bundleno = 1 (0x1), region = 78 }

</bundles_post_ra>
